<compile_context>
chip_gen: v5e
topology: v5e:2x2
jax: 0.10.0
libtpu: 0.0.40
codegen_flags: <defaults>
</compile_context>

<pallas_src>
import functools

import jax
import jax.numpy as jnp
from jax.experimental import pallas as pl
from jax.experimental.pallas import tpu as pltpu


def _round_up(x: int, m: int) -> int:
    return (x + m - 1) // m * m


def _tpu_vmem_and_cores():
    """(vmem_limit_bytes, tensorcores_per_chip) for the current backend."""
    kind = ""
    try:
        kind = jax.devices()[0].device_kind.lower()
    except Exception:
        pass
    if "v7" in kind or "tpu7" in kind:
        # v7x: 64 MiB VMEM per TC, 2 TCs per chip.
        return 56 * 1024 * 1024, 2
    # v5e / v6e: 128 MiB VMEM, 1 TC per chip.
    return 100 * 1024 * 1024, 1


# ---------------------------------------------------------------------------
# Kernel 1: encoder layer (attention + MLP + LayerNorms) -> last hidden state
# ---------------------------------------------------------------------------
def _encoder_kernel(
    x_ref,                                  # (Bt, S, H) f32 block
    wqkv_ref,                               # (H, 3H) bf16, VMEM-resident (Q pre-scaled)
    wo_ref,                                 # (H, H) bf16, VMEM-resident
    w1_ref, w2_ref,                         # (H, F), (F, H) bf16, VMEM-resident
    ln1_g_ref, ln1_b_ref,                   # (1, H) f32, VMEM-resident
    ln2_g_ref, ln2_b_ref,                   # (1, H) f32, VMEM-resident
    hid_ref,                                # (Bt, S, H) f32 output block
):
    Bt, S, H = x_ref.shape
    x = x_ref[...]                          # (Bt, S, H) f32
    x2d = x.reshape(Bt * S, H)              # flattened rows -> large MXU M dim
    x_bf = x2d.astype(jnp.bfloat16)

    # Hoist LayerNorm params once (no per-tile re-broadcast).
    ln1_g = ln1_g_ref[...]
    ln1_b = ln1_b_ref[...]
    ln2_g = ln2_g_ref[...]
    ln2_b = ln2_b_ref[...]

    # 2-D matmul helper: bf16 operands, f32 accumulation on the MXU.
    dot2d = functools.partial(
        jax.lax.dot_general,
        dimension_numbers=(((1,), (0,)), ((), ())),
        preferred_element_type=jnp.float32,
    )

    # --- fused QKV projection: one MXU pass with N = 3H ---
    qkv = dot2d(x_bf, wqkv_ref[...])                        # (Bt*S, 3H) f32
    q = qkv[:, :H].reshape(Bt, S, H)
    k = qkv[:, H:2 * H].reshape(Bt, S, H)
    v = qkv[:, 2 * H:].reshape(Bt, S, H)

    # --- attention: contract last dims directly (no transpose), batched over Bt
    scores = jax.lax.dot_general(
        q.astype(jnp.bfloat16), k.astype(jnp.bfloat16),
        dimension_numbers=(((2,), (2,)), ((0,), (0,))),
        preferred_element_type=jnp.float32,
    )                                                       # (Bt, S, S) f32
    scores = scores - jnp.max(scores, axis=-1, keepdims=True)
    p = jnp.exp(scores)
    p = p * pl.reciprocal(jnp.sum(p, axis=-1, keepdims=True), approx=True)

    attn = jax.lax.dot_general(
        p.astype(jnp.bfloat16), v.astype(jnp.bfloat16),
        dimension_numbers=(((2,), (1,)), ((0,), (0,))),
        preferred_element_type=jnp.float32,
    )                                                       # (Bt, S, H) f32
    attn2d = dot2d(attn.reshape(Bt * S, H).astype(jnp.bfloat16), wo_ref[...])

    # --- residual + LayerNorm 1 (f32) ---
    h = x2d + attn2d
    mu = jnp.mean(h, axis=-1, keepdims=True)
    var = jnp.mean(jnp.square(h - mu), axis=-1, keepdims=True)
    h = (h - mu) * jax.lax.rsqrt(var + 1e-6)
    h = h * ln1_g + ln1_b

    # --- GELU MLP (bf16 matmuls, f32 accumulate) ---
    f = dot2d(h.astype(jnp.bfloat16), w1_ref[...])          # (Bt*S, F)
    f = jax.nn.gelu(f)
    f = dot2d(f.astype(jnp.bfloat16), w2_ref[...])          # (Bt*S, H)

    # --- residual + LayerNorm 2 -> last hidden state ---
    h2 = h + f
    mu2 = jnp.mean(h2, axis=-1, keepdims=True)
    var2 = jnp.mean(jnp.square(h2 - mu2), axis=-1, keepdims=True)
    out = (h2 - mu2) * jax.lax.rsqrt(var2 + 1e-6)
    out = out * ln2_g + ln2_b

    hid_ref[...] = out.reshape(Bt, S, H).astype(hid_ref.dtype)


# ---------------------------------------------------------------------------
# Kernel 2: MLM head — vocab projection, tiled over (row tiles, V tiles)
# ---------------------------------------------------------------------------
def _mlm_head_kernel(h_ref, wdec_ref, bdec_ref, logits_ref):
    h = h_ref[...].astype(jnp.bfloat16)                     # (TM, H)
    acc = jax.lax.dot_general(
        h, wdec_ref[...],
        dimension_numbers=(((1,), (0,)), ((), ())),
        preferred_element_type=jnp.float32,
    )                                                       # (TM, TV) f32
    logits_ref[...] = (acc + bdec_ref[...]).astype(logits_ref.dtype)


# ---------------------------------------------------------------------------
# Tiling helpers
# ---------------------------------------------------------------------------
def _choose_bt(B, S, H, F, vmem_limit, num_cores):
    """Encoder batch-tile: target >=256 flattened rows, capped by VMEM,
    and (on v7x) keep the grid a multiple of the TensorCore count."""
    # Rough f32 bytes per flattened row of in-kernel intermediates:
    # x/q/k/v/attn/h/f-out/h2/out ~ 10*H, MLP intermediate ~ F, scores+probs ~ 2*S.
    per_row = 4 * (10 * H + F + 2 * S)
    max_rows = max(S, (vmem_limit // 2) // max(per_row, 1))
    bt = max(1, (256 + S - 1) // S)                 # target Bt*S >= 256
    bt = min(bt, B, max(1, max_rows // S))
    while B % bt:
        bt -= 1
    if num_cores > 1 and (B // bt) % num_cores != 0:
        cand = bt
        while cand > 1 and (B % cand != 0 or (B // cand) % num_cores != 0):
            cand -= 1
        if B % cand == 0 and (B // cand) % num_cores == 0:
            bt = cand
    return max(bt, 1)


def _choose_head_tiles(R, V, H, vmem_limit):
    """(tm, R_pad, tv, V_pad) for the MLM head. Tiles are lane/sublane aligned;
    inputs are zero-padded to tile multiples instead of degenerate fallbacks."""
    # Vocab tile: 512 lanes when the vocab allows it (fills the 256-wide MXU
    # twice over on v6e/v7x), otherwise the 128-rounded vocab itself.
    if V >= 512:
        tv = 512
    else:
        tv = _round_up(V, 128)
    V_pad = _round_up(V, tv)

    # Row tile: up to 2048 rows (amortizes wdec re-streaming), multiple of 8,
    # bounded so double-buffered input/output tiles stay well inside VMEM.
    tm = min(2048, _round_up(R, 8))
    # bytes per row-tile step: 2x(tm,H) f32 in + 2x(tm,tv) f32 out + 2x(H,tv) bf16 w
    def step_bytes(t):
        return 2 * t * H * 4 + 2 * t * tv * 4 + 2 * H * tv * 2
    while tm > 8 and step_bytes(tm) > vmem_limit // 2:
        tm //= 2
    tm = max(8, _round_up(tm, 8))
    R_pad = _round_up(R, tm)
    return tm, R_pad, tv, V_pad


# ---------------------------------------------------------------------------
# Wrappers
# ---------------------------------------------------------------------------
def prepare_params(params):
    """Cast matmul weights to bf16, fuse QKV (fold 1/sqrt(H) into the Q slice)."""
    H = params["wq"].shape[0]
    inv_sqrt_h = 1.0 / jnp.sqrt(jnp.float32(H))
    bf = jnp.bfloat16
    f32 = jnp.float32
    wqkv = jnp.concatenate(
        [params["wq"] * inv_sqrt_h, params["wk"], params["wv"]], axis=1
    ).astype(bf)                                            # (H, 3H)
    return {
        "wqkv": wqkv,
        "wo": params["wo"].astype(bf),
        "w1": params["w1"].astype(bf),
        "w2": params["w2"].astype(bf),
        "ln1_g": params["ln1_g"].astype(f32),
        "ln1_b": params["ln1_b"].astype(f32),
        "ln2_g": params["ln2_g"].astype(f32),
        "ln2_b": params["ln2_b"].astype(f32),
        "wdec": params["wdec"].astype(bf),
        "bdec": params["bdec"].astype(f32),
    }


def encode_pallas(x_emb, p):
    """x_emb: (B, S, H) f32 embeddings. Returns (logits (B,S,V), hidden (B,S,H))."""
    B, S, H = x_emb.shape
    V = p["wdec"].shape[1]
    F = p["w1"].shape[1]

    vmem_limit, num_cores = _tpu_vmem_and_cores()

    # --- encoder batch tiling ---
    bt = _choose_bt(B, S, H, F, vmem_limit, num_cores)

    # Invariant weights: whole-array VMEM residency (single copy, no per-step DMA).
    vmem_resident = pl.BlockSpec(memory_space=pltpu.MemorySpace.VMEM)

    hidden = pl.pallas_call(
        _encoder_kernel,
        out_shape=jax.ShapeDtypeStruct((B, S, H), jnp.float32),
        grid_spec=pltpu.PrefetchScalarGridSpec(
            num_scalar_prefetch=0,
            grid=(B // bt,),
            in_specs=[
                pl.BlockSpec((bt, S, H), lambda b: (b, 0, 0)),   # x (pipelined)
                vmem_resident,                                   # wqkv
                vmem_resident,                                   # wo
                vmem_resident, vmem_resident,                    # w1 w2
                vmem_resident, vmem_resident,                    # ln1 g/b
                vmem_resident, vmem_resident,                    # ln2 g/b
            ],
            out_specs=pl.BlockSpec((bt, S, H), lambda b: (b, 0, 0)),
        ),
        compiler_params=pltpu.CompilerParams(
            dimension_semantics=("parallel",),
            vmem_limit_bytes=vmem_limit,
        ),
    )(
        x_emb,
        p["wqkv"], p["wo"],
        p["w1"], p["w2"],
        p["ln1_g"], p["ln1_b"], p["ln2_g"], p["ln2_b"],
    )

    # --- MLM head: separate pallas_call, tiled over (row tiles, V tiles).
    R = B * S
    tm, R_pad, tv, V_pad = _choose_head_tiles(R, V, H, vmem_limit)

    h_flat = hidden.reshape(R, H)
    if R_pad != R:
        h_flat = jnp.pad(h_flat, ((0, R_pad - R), (0, 0)))
    wdec = p["wdec"]
    bdec = p["bdec"]
    if V_pad != V:
        # NOTE: in a real pipeline pad once at prepare time, not per call.
        wdec = jnp.pad(wdec, ((0, 0), (0, V_pad - V)))
        bdec = jnp.pad(bdec, ((0, 0), (0, V_pad - V)))

    logits_flat = pl.pallas_call(
        _mlm_head_kernel,
        out_shape=jax.ShapeDtypeStruct((R_pad, V_pad), jnp.float32),
        grid_spec=pltpu.PrefetchScalarGridSpec(
            num_scalar_prefetch=0,
            grid=(R_pad // tm, V_pad // tv),        # rows outer, V inner
            in_specs=[
                pl.BlockSpec((tm, H), lambda i, j: (i, 0)),     # hidden rows
                pl.BlockSpec((H, tv), lambda i, j: (0, j)),     # wdec V-tile
                pl.BlockSpec((1, tv), lambda i, j: (0, j)),     # bdec V-tile
            ],
            out_specs=pl.BlockSpec((tm, tv), lambda i, j: (i, j)),
        ),
        compiler_params=pltpu.CompilerParams(
            dimension_semantics=("parallel", "parallel"),
            vmem_limit_bytes=vmem_limit,
        ),
    )(h_flat, wdec, bdec)

    logits = logits_flat[:R, :V].reshape(B, S, V)
    # Base._encode returns (logits, hidden_states[-1])
    return logits, hidden


def encode_reference(x_emb, p):
    """Pure-JAX reference mirroring the kernel math (same bf16 casts)."""
    bf = jnp.bfloat16
    f32 = jnp.float32
    H = x_emb.shape[-1]
    wq = p["wqkv"][:, :H]
    wk = p["wqkv"][:, H:2 * H]
    wv = p["wqkv"][:, 2 * H:]
    x = x_emb.astype(f32)
    xb = x.astype(bf)
    q = jnp.einsum("bsh,hd->bsd", xb, wq, preferred_element_type=f32)
    k = jnp.einsum("bsh,hd->bsd", xb, wk, preferred_element_type=f32)
    v = jnp.einsum("bsh,hd->bsd", xb, wv, preferred_element_type=f32)
    scores = jnp.einsum("bsd,btd->bst", q.astype(bf), k.astype(bf),
                        preferred_element_type=f32)
    probs = jax.nn.softmax(scores, axis=-1)
    attn = jnp.einsum("bst,btd->bsd", probs.astype(bf), v.astype(bf),
                      preferred_element_type=f32)
    attn = jnp.einsum("bsd,dh->bsh", attn.astype(bf), p["wo"],
                      preferred_element_type=f32)
    h = x + attn
    mu = jnp.mean(h, axis=-1, keepdims=True)
    var = jnp.mean(jnp.square(h - mu), axis=-1, keepdims=True)
    h = (h - mu) * jax.lax.rsqrt(var + 1e-6) * p["ln1_g"] + p["ln1_b"]
    f = jnp.einsum("bsh,hf->bsf", h.astype(bf), p["w1"], preferred_element_type=f32)
    f = jax.nn.gelu(f)
    f = jnp.einsum("bsf,fh->bsh", f.astype(bf), p["w2"], preferred_element_type=f32)
    h2 = h + f
    mu2 = jnp.mean(h2, axis=-1, keepdims=True)
    var2 = jnp.mean(jnp.square(h2 - mu2), axis=-1, keepdims=True)
    out = (h2 - mu2) * jax.lax.rsqrt(var2 + 1e-6) * p["ln2_g"] + p["ln2_b"]
    logits = jnp.einsum("bsh,hv->bsv", out.astype(bf), p["wdec"],
                        preferred_element_type=f32) + p["bdec"]
    return logits, out


def init_params(key, H, F, V):
    ks = jax.random.split(key, 8)
    s = 0.02
    return {
        "emb":   jax.random.normal(ks[0], (V, H), jnp.float32) * s,
        "wq":    jax.random.normal(ks[1], (H, H), jnp.float32) * s,
        "wk":    jax.random.normal(ks[2], (H, H), jnp.float32) * s,
        "wv":    jax.random.normal(ks[3], (H, H), jnp.float32) * s,
        "wo":    jax.random.normal(ks[4], (H, H), jnp.float32) * s,
        "w1":    jax.random.normal(ks[5], (H, F), jnp.float32) * s,
        "w2":    jax.random.normal(ks[6], (F, H), jnp.float32) * s,
        "ln1_g": jnp.ones((1, H), jnp.float32),
        "ln1_b": jnp.zeros((1, H), jnp.float32),
        "ln2_g": jnp.ones((1, H), jnp.float32),
        "ln2_b": jnp.zeros((1, H), jnp.float32),
        "wdec":  jax.random.normal(ks[7], (H, V), jnp.float32) * s,
        "bdec":  jnp.zeros((1, V), jnp.float32),
    }


if __name__ == "__main__":
    B, S, H, F, V = 2, 8, 128, 256, 256

    key = jax.random.PRNGKey(0)
    k_param, k_ids = jax.random.split(key)
    params = init_params(k_param, H, F, V)
    prepped = prepare_params(params)

    # Glue: "tokenized" input ids + embedding lookup (gather) in plain JAX.
    # TODO(synk): tokenizer / HF checkpoint loading has no Pallas equivalent; ids are synthetic.
    input_ids = jax.random.randint(k_ids, (B, S), 0, V, dtype=jnp.int32)
    pos = jnp.arange(S)[None, :]                       # position_ids as in _encode_accelerate
    pos_emb = 0.01 * jnp.sin(pos[..., None] * jnp.arange(H)[None, None, :] / 64.0)
    x_emb = params["emb"][input_ids] + pos_emb.astype(jnp.float32)

    logits, hidden = encode_pallas(x_emb, prepped)
    jax.block_until_ready((logits, hidden))

    ref_logits, ref_hidden = encode_reference(x_emb, prepped)
    assert logits.shape == (B, S, V) and hidden.shape == (B, S, H)
    assert jnp.allclose(hidden, ref_hidden, rtol=2e-2, atol=2e-2), \
        float(jnp.max(jnp.abs(hidden - ref_hidden)))
    assert jnp.allclose(logits, ref_logits, rtol=2e-2, atol=2e-2), \
        float(jnp.max(jnp.abs(logits - ref_logits)))

    print("KERNEL_OK")
</pallas_src>

<mosaic_0001>
module attributes {stable_mosaic.version = 11 : i64} {
  func.func @_encoder_kernel(%arg0: i32, %arg1: memref<2x8x128xf32, #tpu.memory_space<vmem>>, %arg2: memref<128x384xbf16, #tpu.memory_space<vmem>>, %arg3: memref<128x128xbf16, #tpu.memory_space<vmem>>, %arg4: memref<128x256xbf16, #tpu.memory_space<vmem>>, %arg5: memref<256x128xbf16, #tpu.memory_space<vmem>>, %arg6: memref<1x128xf32, #tpu.memory_space<vmem>>, %arg7: memref<1x128xf32, #tpu.memory_space<vmem>>, %arg8: memref<1x128xf32, #tpu.memory_space<vmem>>, %arg9: memref<1x128xf32, #tpu.memory_space<vmem>>, %arg10: memref<2x8x128xf32, #tpu.memory_space<vmem>>) attributes {dimension_semantics = [#tpu.dimension_semantics<parallel>], iteration_bounds = array<i64: 1>, scalar_prefetch = 0 : i64, scratch_operands = 0 : i64, tpu.core_type = #tpu.core_type<tc>, window_params = [{transform_indices = @transform_0, window_bounds = array<i64: 2, 8, 128>}, {pipeline_mode = #tpu.pipeline_mode<synchronous>, transform_indices = @transform_1, window_bounds = array<i64: 128, 384>}, {pipeline_mode = #tpu.pipeline_mode<synchronous>, transform_indices = @transform_2, window_bounds = array<i64: 128, 128>}, {pipeline_mode = #tpu.pipeline_mode<synchronous>, transform_indices = @transform_3, window_bounds = array<i64: 128, 256>}, {pipeline_mode = #tpu.pipeline_mode<synchronous>, transform_indices = @transform_4, window_bounds = array<i64: 256, 128>}, {pipeline_mode = #tpu.pipeline_mode<synchronous>, transform_indices = @transform_5, window_bounds = array<i64: 1, 128>}, {pipeline_mode = #tpu.pipeline_mode<synchronous>, transform_indices = @transform_6, window_bounds = array<i64: 1, 128>}, {pipeline_mode = #tpu.pipeline_mode<synchronous>, transform_indices = @transform_7, window_bounds = array<i64: 1, 128>}, {pipeline_mode = #tpu.pipeline_mode<synchronous>, transform_indices = @transform_8, window_bounds = array<i64: 1, 128>}, {transform_indices = @transform_9, window_bounds = array<i64: 2, 8, 128>}]} {
    %c0 = arith.constant 0 : index
    %c0_0 = arith.constant 0 : index
    %c0_1 = arith.constant 0 : index
    %0 = vector.load %arg1[%c0, %c0_0, %c0_1] : memref<2x8x128xf32, #tpu.memory_space<vmem>>, vector<2x8x128xf32>
    %1 = vector.shape_cast %0 : vector<2x8x128xf32> to vector<16x128xf32>
    %2 = arith.truncf %1 : vector<16x128xf32> to vector<16x128xbf16>
    %c0_2 = arith.constant 0 : index
    %c0_3 = arith.constant 0 : index
    %3 = vector.load %arg6[%c0_2, %c0_3] : memref<1x128xf32, #tpu.memory_space<vmem>>, vector<1x128xf32>
    %c0_4 = arith.constant 0 : index
    %c0_5 = arith.constant 0 : index
    %4 = vector.load %arg7[%c0_4, %c0_5] : memref<1x128xf32, #tpu.memory_space<vmem>>, vector<1x128xf32>
    %c0_6 = arith.constant 0 : index
    %c0_7 = arith.constant 0 : index
    %5 = vector.load %arg8[%c0_6, %c0_7] : memref<1x128xf32, #tpu.memory_space<vmem>>, vector<1x128xf32>
    %c0_8 = arith.constant 0 : index
    %c0_9 = arith.constant 0 : index
    %6 = vector.load %arg9[%c0_8, %c0_9] : memref<1x128xf32, #tpu.memory_space<vmem>>, vector<1x128xf32>
    %c0_10 = arith.constant 0 : index
    %c0_11 = arith.constant 0 : index
    %7 = vector.load %arg2[%c0_10, %c0_11] : memref<128x384xbf16, #tpu.memory_space<vmem>>, vector<128x384xbf16>
    %cst = arith.constant dense<0.000000e+00> : vector<16x384xf32>
    %8 = tpu.matmul %2, %7, %cst {dimension_numbers = #tpu.dot_dimension_numbers<[1], [0], [0], [1], [0, 0, 1, 1], [], []>} : vector<16x128xbf16>, vector<128x384xbf16>, vector<16x384xf32> -> vector<16x384xf32>
    %9 = vector.extract_strided_slice %8 {offsets = [0, 0], sizes = [16, 128], strides = [1, 1]} : vector<16x384xf32> to vector<16x128xf32>
    %10 = vector.shape_cast %9 : vector<16x128xf32> to vector<2x8x128xf32>
    %11 = vector.extract_strided_slice %8 {offsets = [0, 128], sizes = [16, 128], strides = [1, 1]} : vector<16x384xf32> to vector<16x128xf32>
    %12 = vector.shape_cast %11 : vector<16x128xf32> to vector<2x8x128xf32>
    %13 = vector.extract_strided_slice %8 {offsets = [0, 256], sizes = [16, 128], strides = [1, 1]} : vector<16x384xf32> to vector<16x128xf32>
    %14 = vector.shape_cast %13 : vector<16x128xf32> to vector<2x8x128xf32>
    %15 = arith.truncf %10 : vector<2x8x128xf32> to vector<2x8x128xbf16>
    %16 = arith.truncf %12 : vector<2x8x128xf32> to vector<2x8x128xbf16>
    %cst_12 = arith.constant dense<0.000000e+00> : vector<2x8x8xf32>
    %17 = tpu.matmul %15, %16, %cst_12 {dimension_numbers = #tpu.dot_dimension_numbers<[2], [2], [1], [1], [0, 0, 0, 1, 1, 1], [0], [0]>} : vector<2x8x128xbf16>, vector<2x8x128xbf16>, vector<2x8x8xf32> -> vector<2x8x8xf32>
    %cst_13 = arith.constant dense<0xFF800000> : vector<2x8xf32>
    %18 = vector.multi_reduction <maximumf>, %17, %cst_13 [2] : vector<2x8x8xf32> to vector<2x8xf32>
    %19 = vector.shape_cast %18 : vector<2x8xf32> to vector<2x8x1xf32>
    %20 = vector.broadcast %19 : vector<2x8x1xf32> to vector<2x8x8xf32>
    %21 = arith.subf %17, %20 : vector<2x8x8xf32>
    %22 = math.exp %21 : vector<2x8x8xf32>
    %cst_14 = arith.constant dense<0.000000e+00> : vector<2x8xf32>
    %23 = vector.multi_reduction <add>, %22, %cst_14 [2] : vector<2x8x8xf32> to vector<2x8xf32>
    %24 = vector.shape_cast %23 : vector<2x8xf32> to vector<2x8x1xf32>
    %25 = tpu.reciprocal %24 {approx = true} : vector<2x8x1xf32> -> vector<2x8x1xf32>
    %26 = vector.broadcast %25 : vector<2x8x1xf32> to vector<2x8x8xf32>
    %27 = arith.mulf %22, %26 : vector<2x8x8xf32>
    %28 = arith.truncf %27 : vector<2x8x8xf32> to vector<2x8x8xbf16>
    %29 = arith.truncf %14 : vector<2x8x128xf32> to vector<2x8x128xbf16>
    %cst_15 = arith.constant dense<0.000000e+00> : vector<2x8x128xf32>
    %30 = tpu.matmul %28, %29, %cst_15 {dimension_numbers = #tpu.dot_dimension_numbers<[2], [1], [1], [2], [0, 0, 0, 1, 1, 2], [0], [0]>} : vector<2x8x8xbf16>, vector<2x8x128xbf16>, vector<2x8x128xf32> -> vector<2x8x128xf32>
    %31 = vector.shape_cast %30 : vector<2x8x128xf32> to vector<16x128xf32>
    %32 = arith.truncf %31 : vector<16x128xf32> to vector<16x128xbf16>
    %c0_16 = arith.constant 0 : index
    %c0_17 = arith.constant 0 : index
    %33 = vector.load %arg3[%c0_16, %c0_17] : memref<128x128xbf16, #tpu.memory_space<vmem>>, vector<128x128xbf16>
    %cst_18 = arith.constant dense<0.000000e+00> : vector<16x128xf32>
    %34 = tpu.matmul %32, %33, %cst_18 {dimension_numbers = #tpu.dot_dimension_numbers<[1], [0], [0], [1], [0, 0, 1, 1], [], []>} : vector<16x128xbf16>, vector<128x128xbf16>, vector<16x128xf32> -> vector<16x128xf32>
    %35 = arith.addf %1, %34 : vector<16x128xf32>
    %cst_19 = arith.constant dense<0.000000e+00> : vector<16xf32>
    %36 = vector.multi_reduction <add>, %35, %cst_19 [1] : vector<16x128xf32> to vector<16xf32>
    %37 = vector.shape_cast %36 : vector<16xf32> to vector<16x1xf32>
    %cst_20 = arith.constant 1.280000e+02 : f32
    %38 = vector.broadcast %cst_20 : f32 to vector<16x1xf32>
    %39 = arith.divf %37, %38 : vector<16x1xf32>
    %40 = vector.broadcast %39 : vector<16x1xf32> to vector<16x128xf32>
    %41 = arith.subf %35, %40 : vector<16x128xf32>
    %42 = arith.mulf %41, %41 : vector<16x128xf32>
    %cst_21 = arith.constant dense<0.000000e+00> : vector<16xf32>
    %43 = vector.multi_reduction <add>, %42, %cst_21 [1] : vector<16x128xf32> to vector<16xf32>
    %44 = vector.shape_cast %43 : vector<16xf32> to vector<16x1xf32>
    %cst_22 = arith.constant 1.280000e+02 : f32
    %45 = vector.broadcast %cst_22 : f32 to vector<16x1xf32>
    %46 = arith.divf %44, %45 : vector<16x1xf32>
    %47 = vector.broadcast %39 : vector<16x1xf32> to vector<16x128xf32>
    %48 = arith.subf %35, %47 : vector<16x128xf32>
    %cst_23 = arith.constant 9.99999997E-7 : f32
    %49 = vector.broadcast %cst_23 : f32 to vector<16x1xf32>
    %50 = arith.addf %46, %49 : vector<16x1xf32>
    %51 = math.rsqrt %50 : vector<16x1xf32>
    %52 = vector.broadcast %51 : vector<16x1xf32> to vector<16x128xf32>
    %53 = arith.mulf %48, %52 : vector<16x128xf32>
    %54 = vector.broadcast %3 : vector<1x128xf32> to vector<16x128xf32>
    %55 = arith.mulf %53, %54 : vector<16x128xf32>
    %56 = vector.broadcast %4 : vector<1x128xf32> to vector<16x128xf32>
    %57 = arith.addf %55, %56 : vector<16x128xf32>
    %58 = arith.truncf %57 : vector<16x128xf32> to vector<16x128xbf16>
    %c0_24 = arith.constant 0 : index
    %c0_25 = arith.constant 0 : index
    %59 = vector.load %arg4[%c0_24, %c0_25] : memref<128x256xbf16, #tpu.memory_space<vmem>>, vector<128x256xbf16>
    %cst_26 = arith.constant dense<0.000000e+00> : vector<16x256xf32>
    %60 = tpu.matmul %58, %59, %cst_26 {dimension_numbers = #tpu.dot_dimension_numbers<[1], [0], [0], [1], [0, 0, 1, 1], [], []>} : vector<16x128xbf16>, vector<128x256xbf16>, vector<16x256xf32> -> vector<16x256xf32>
    %61 = arith.mulf %60, %60 : vector<16x256xf32>
    %62 = arith.mulf %60, %61 : vector<16x256xf32>
    %cst_27 = arith.constant 4.471500e-02 : f32
    %63 = vector.broadcast %cst_27 : f32 to vector<16x256xf32>
    %64 = arith.mulf %63, %62 : vector<16x256xf32>
    %65 = arith.addf %60, %64 : vector<16x256xf32>
    %cst_28 = arith.constant 0.797884583 : f32
    %66 = vector.broadcast %cst_28 : f32 to vector<16x256xf32>
    %67 = arith.mulf %66, %65 : vector<16x256xf32>
    %68 = math.tanh %67 : vector<16x256xf32>
    %cst_29 = arith.constant 1.000000e+00 : f32
    %69 = vector.broadcast %cst_29 : f32 to vector<16x256xf32>
    %70 = arith.addf %69, %68 : vector<16x256xf32>
    %cst_30 = arith.constant 5.000000e-01 : f32
    %71 = vector.broadcast %cst_30 : f32 to vector<16x256xf32>
    %72 = arith.mulf %71, %70 : vector<16x256xf32>
    %73 = arith.mulf %60, %72 : vector<16x256xf32>
    %74 = arith.truncf %73 : vector<16x256xf32> to vector<16x256xbf16>
    %c0_31 = arith.constant 0 : index
    %c0_32 = arith.constant 0 : index
    %75 = vector.load %arg5[%c0_31, %c0_32] : memref<256x128xbf16, #tpu.memory_space<vmem>>, vector<256x128xbf16>
    %cst_33 = arith.constant dense<0.000000e+00> : vector<16x128xf32>
    %76 = tpu.matmul %74, %75, %cst_33 {dimension_numbers = #tpu.dot_dimension_numbers<[1], [0], [0], [1], [0, 0, 1, 1], [], []>} : vector<16x256xbf16>, vector<256x128xbf16>, vector<16x128xf32> -> vector<16x128xf32>
    %77 = arith.addf %57, %76 : vector<16x128xf32>
    %cst_34 = arith.constant dense<0.000000e+00> : vector<16xf32>
    %78 = vector.multi_reduction <add>, %77, %cst_34 [1] : vector<16x128xf32> to vector<16xf32>
    %79 = vector.shape_cast %78 : vector<16xf32> to vector<16x1xf32>
    %cst_35 = arith.constant 1.280000e+02 : f32
    %80 = vector.broadcast %cst_35 : f32 to vector<16x1xf32>
    %81 = arith.divf %79, %80 : vector<16x1xf32>
    %82 = vector.broadcast %81 : vector<16x1xf32> to vector<16x128xf32>
    %83 = arith.subf %77, %82 : vector<16x128xf32>
    %84 = arith.mulf %83, %83 : vector<16x128xf32>
    %cst_36 = arith.constant dense<0.000000e+00> : vector<16xf32>
    %85 = vector.multi_reduction <add>, %84, %cst_36 [1] : vector<16x128xf32> to vector<16xf32>
    %86 = vector.shape_cast %85 : vector<16xf32> to vector<16x1xf32>
    %cst_37 = arith.constant 1.280000e+02 : f32
    %87 = vector.broadcast %cst_37 : f32 to vector<16x1xf32>
    %88 = arith.divf %86, %87 : vector<16x1xf32>
    %89 = vector.broadcast %81 : vector<16x1xf32> to vector<16x128xf32>
    %90 = arith.subf %77, %89 : vector<16x128xf32>
    %cst_38 = arith.constant 9.99999997E-7 : f32
    %91 = vector.broadcast %cst_38 : f32 to vector<16x1xf32>
    %92 = arith.addf %88, %91 : vector<16x1xf32>
    %93 = math.rsqrt %92 : vector<16x1xf32>
    %94 = vector.broadcast %93 : vector<16x1xf32> to vector<16x128xf32>
    %95 = arith.mulf %90, %94 : vector<16x128xf32>
    %96 = vector.broadcast %5 : vector<1x128xf32> to vector<16x128xf32>
    %97 = arith.mulf %95, %96 : vector<16x128xf32>
    %98 = vector.broadcast %6 : vector<1x128xf32> to vector<16x128xf32>
    %99 = arith.addf %97, %98 : vector<16x128xf32>
    %100 = vector.shape_cast %99 : vector<16x128xf32> to vector<2x8x128xf32>
    %c0_39 = arith.constant 0 : index
    %c0_40 = arith.constant 0 : index
    %c0_41 = arith.constant 0 : index
    %101 = vector.load %arg10[%c0_39, %c0_40, %c0_41] : memref<2x8x128xf32, #tpu.memory_space<vmem>>, vector<2x8x128xf32>
    tpu.vector_store %arg10[%c0_39, %c0_40, %c0_41], %100 {strides = array<i32>} : memref<2x8x128xf32, #tpu.memory_space<vmem>>, vector<2x8x128xf32>,
    return
  }
  func.func @transform_0(%arg0: i32) -> (i32, i32, i32) {
    %c0_i32 = arith.constant 0 : i32
    %c0_i32_0 = arith.constant 0 : i32
    %c0_i32_1 = arith.constant 0 : i32
    return %arg0, %c0_i32, %c0_i32_0 : i32, i32, i32
  }
  func.func @transform_1(%arg0: i32) -> (i32, i32) {
    %c0_i32 = arith.constant 0 : i32
    %c0_i32_0 = arith.constant 0 : i32
    %c0_i32_1 = arith.constant 0 : i32
    return %c0_i32, %c0_i32_0 : i32, i32
  }
  func.func @transform_2(%arg0: i32) -> (i32, i32) {
    %c0_i32 = arith.constant 0 : i32
    %c0_i32_0 = arith.constant 0 : i32
    %c0_i32_1 = arith.constant 0 : i32
    return %c0_i32, %c0_i32_0 : i32, i32
  }
  func.func @transform_3(%arg0: i32) -> (i32, i32) {
    %c0_i32 = arith.constant 0 : i32
    %c0_i32_0 = arith.constant 0 : i32
    %c0_i32_1 = arith.constant 0 : i32
    return %c0_i32, %c0_i32_0 : i32, i32
  }
  func.func @transform_4(%arg0: i32) -> (i32, i32) {
    %c0_i32 = arith.constant 0 : i32
    %c0_i32_0 = arith.constant 0 : i32
    %c0_i32_1 = arith.constant 0 : i32
    return %c0_i32, %c0_i32_0 : i32, i32
  }
  func.func @transform_5(%arg0: i32) -> (i32, i32) {
    %c0_i32 = arith.constant 0 : i32
    %c0_i32_0 = arith.constant 0 : i32
    %c0_i32_1 = arith.constant 0 : i32
    return %c0_i32, %c0_i32_0 : i32, i32
  }
  func.func @transform_6(%arg0: i32) -> (i32, i32) {
    %c0_i32 = arith.constant 0 : i32
    %c0_i32_0 = arith.constant 0 : i32
    %c0_i32_1 = arith.constant 0 : i32
    return %c0_i32, %c0_i32_0 : i32, i32
  }
  func.func @transform_7(%arg0: i32) -> (i32, i32) {
    %c0_i32 = arith.constant 0 : i32
    %c0_i32_0 = arith.constant 0 : i32
    %c0_i32_1 = arith.constant 0 : i32
    return %c0_i32, %c0_i32_0 : i32, i32
  }
  func.func @transform_8(%arg0: i32) -> (i32, i32) {
    %c0_i32 = arith.constant 0 : i32
    %c0_i32_0 = arith.constant 0 : i32
    %c0_i32_1 = arith.constant 0 : i32
    return %c0_i32, %c0_i32_0 : i32, i32
  }
  func.func @transform_9(%arg0: i32) -> (i32, i32, i32) {
    %c0_i32 = arith.constant 0 : i32
    %c0_i32_0 = arith.constant 0 : i32
    %c0_i32_1 = arith.constant 0 : i32
    return %arg0, %c0_i32, %c0_i32_0 : i32, i32, i32
  }
}

</mosaic_0001>

<bundles_post_ra>
// kernel: tpu_custom_call.1
= control target key start
LH: loop header
LB: loop body
LE: loop exit
PB: predicated region body
PF: predicated region fallthrough
CT: control target
= control target key end

     0   :  { %14 = vsyncpa [#allocation3], 0  ;;  %s1610_s0 = inlined_call_operand.hbm [shape: f32[2,8,128], index: 0, kind: input, shape index: {}]   ;;  %s1611_s1 = inlined_call_operand.hbm [shape: bf16[128,384], index: 1, kind: input, shape index: {}]   ;;  %s1612_s2 = inlined_call_operand.hbm [shape: bf16[128,128], index: 2, kind: input, shape index: {}]   ;;  %s1613_s3 = inlined_call_operand.hbm [shape: bf16[128,256], index: 3, kind: input, shape index: {}]   ;;  %s1614_s4 = inlined_call_operand.hbm [shape: bf16[256,128], index: 4, kind: input, shape index: {}]   ;;  %s1615_s5 = inlined_call_operand.vmem [shape: f32[1,128], index: 5, kind: input, shape index: {}]   ;;  %s1616_s6 = inlined_call_operand.vmem [shape: f32[1,128], index: 6, kind: input, shape index: {}]   ;;  %s1617_s7 = inlined_call_operand.vmem [shape: f32[1,128], index: 7, kind: input, shape index: {}]   ;;  %s1618_s8 = inlined_call_operand.vmem [shape: f32[1,128], index: 8, kind: input, shape index: {}]   ;;  %s1619_s9 = inlined_call_operand.hbm [shape: f32[2,8,128], index: 9, kind: output, shape index: {}]  }
   0x1   :  { %15 = vsyncpa [#allocation6], 0 }
   0x2   :  { %16 = vsyncpa [#allocation9], 0  ;;  %s35_s11 = sshll.u32 %s1611_s1, 4  ;;  %s36_s11 = int_to_ptr.hbm [resolvable:$true] %s35_s11 }
   0x3   :  { %17 = vsyncpa [#allocation4], 0  ;;  %s1466_s12 = smov [#allocation5]   ;;  %s1467_s14 = smov 192  }
   0x4   :  { %s37_s13 = sshll.u32 %s1466_s12, 4  ;;  %s1468_s15 = smov 12   ;;  %s38_s13 = int_to_ptr.vmem [resolvable:$true] %s37_s13 }
   0x5   :  { %43 = dma.hbm_to_vmem [thread:$0]  %s36_s11, 3072, %s38_s13, [#allocation6], %s1467_s14, %s1467_s14, %s1468_s15  }
   0x6   :  { %s61_s18 = sshll.u32 %s1613_s3, 4  ;;  %s1469_s19 = smov [#allocation8]   ;;  %s62_s18 = int_to_ptr.hbm [resolvable:$true] %s61_s18 }
   0x7   :  { %s63_s20 = sshll.u32 %s1469_s19, 4  ;;  %s22_s23 = sshll.u32 %s1610_s0, 4  ;;  %s64_s20 = int_to_ptr.vmem [resolvable:$true] %s63_s20  ;;  %s23_s23 = int_to_ptr.hbm [resolvable:$true] %s22_s23 }
   0x8   :  { %s1470_s1 = smov 128   ;;  %s1471_s24 = smov 8  }
   0x9   :  { %69 = dma.hbm_to_vmem [thread:$0]  %s62_s18, 2048, %s64_s20, [#allocation9], %s1470_s1, %s1470_s1, %s1471_s24  }
   0xa   :  { %s48_s27 = sshll.u32 %s1612_s2, 4  ;;  %s1472_s3 = smov [#allocation2]   ;;  %s49_s27 = int_to_ptr.hbm [resolvable:$true] %s48_s27 }
   0xb   :  { %s24_s28 = sshll.u32 %s1472_s3, 4  ;;  %s1473_s0 = smov [#allocation7]   ;;  %s25_s28 = int_to_ptr.vmem [resolvable:$true] %s24_s28 }
   0xc   :  { %30 = dma.hbm_to_vmem [thread:$0]  %s23_s23, 256, %s25_s28, [#allocation3], %s1470_s1, %s1470_s1, %s1471_s24  }
   0xd   :  { %s50_s29 = sshll.u32 %s1473_s0, 4  ;;  %s1474_s30 = smov 64   ;;  %s51_s29 = int_to_ptr.vmem [resolvable:$true] %s50_s29 }
   0xe   :  { %s1475_s10 = smov 4   ;;  %s74_s13 = sshll.u32 %s1614_s4, 4  ;;  %s75_s13 = int_to_ptr.hbm [resolvable:$true] %s74_s13 }
   0xf   :  { %56 = dma.hbm_to_vmem [thread:$0]  %s49_s27, 1024, %s51_s29, [#allocation6], %s1474_s30, %s1474_s30, %s1475_s10  }
  0x10   :  { %s1476_s2 = smov [#allocation10]  }
  0x11   :  { %s76_s14 = sshll.u32 %s1476_s2, 4  ;;  %s77_s14 = int_to_ptr.vmem [resolvable:$true] %s76_s14 }
  0x12   :  { %82 = dma.hbm_to_vmem [thread:$0]  %s75_s13, 2048, %s77_s14, [#allocation9], %s1474_s30, %s1474_s30, %s1475_s10  }
  0x13   :  { %1458 = dma.done.wait [#allocation3], 256  }
  0x14   :  { %1459 = vsyncadd [#allocation3], 4294967040 }
  0x15   :  { %1460 = dma.done.wait [#allocation6], 4096  }
  0x16   :  { %1461 = vsyncadd [#allocation6], 4294963200 }
  0x17   :  { %1462 = dma.done.wait [#allocation9], 4096  }
  0x18   :  { %1463 = vsyncadd [#allocation9], 4294963200  ;;  %v1035_v0 = vld [vmem:[#allocation5 + $0xa8] sm:$0xf]  ;;  %v1229_v1 = vld [vmem:[#allocation5 + $0xb0] sm:$0xf0] }
  0x19   :  { %v1228_v2 = vld [vmem:[#allocation5 + $0xac] sm:$0xf]  ;;  %v1036_v3 = vor.u32 %v1229_v1, %v1035_v0  ;;  %v1037_v4 = vld [vmem:[#allocation5 + $0xb4] sm:$0xf0]  ;;  %v1023_v5 = vld [vmem:[#allocation5 + $0x90] sm:$0xf] }
  0x1a   :  { %v1226_v6 = vld [vmem:[#allocation5 + $0x98] sm:$0xf0]  ;;  %v1040_v7 = vor.u32 %v1228_v2, %v1037_v4  ;;  %v1225_v8 = vld [vmem:[#allocation5 + $0x94] sm:$0xf]  ;;  %v1025_v9 = vld [vmem:[#allocation5 + $0x9c] sm:$0xf0] }
  0x1b   :  { %279 = vmatpush.bf16.msra.mxu0 %v1036_v3  ;;  %v1024_v10 = vor.u32 %v1226_v6, %v1023_v5  ;;  %v1028_v11 = vor.u32 %v1225_v8, %v1025_v9  ;;  %v1011_v12 = vld [vmem:[#allocation5 + $0x78] sm:$0xf]  ;;  %v1223_v13 = vld [vmem:[#allocation5 + $0x80] sm:$0xf0]  ;;  %v1222_v14 = vld [vmem:[#allocation5 + $0x7c] sm:$0xf] }
  0x1c   :  { %293 = vmatpush.bf16.msra.mxu1 %v1040_v7  ;;  %v1013_v15 = vld [vmem:[#allocation5 + $0x84] sm:$0xf0]  ;;  %v1012_v16 = vor.u32 %v1223_v13, %v1011_v12  ;;  %v999_v18 = vld [vmem:[#allocation5 + $0x60] sm:$0xf]  ;;  %v1220_v19 = vld [vmem:[#allocation5 + $0x68] sm:$0xf0] }
  0x1d   :  { %v1016_v17 = vor.u32 %v1222_v14, %v1013_v15  ;;  %v1219_v20 = vld [vmem:[#allocation5 + $0x64] sm:$0xf]  ;;  %v1001_v21 = vld [vmem:[#allocation5 + $0x6c] sm:$0xf0]  ;;  %v1000_v22 = vor.u32 %v1220_v19, %v999_v18  ;;  %v987_v23 = vld [vmem:[#allocation5 + $0x48] sm:$0xf] }
  0x1e   :  { %v1004_v24 = vor.u32 %v1219_v20, %v1001_v21  ;;  %v1217_v25 = vld [vmem:[#allocation5 + $0x50] sm:$0xf0]  ;;  %v1216_v26 = vld [vmem:[#allocation5 + $0x4c] sm:$0xf]  ;;  %v989_v27 = vld [vmem:[#allocation5 + $0x54] sm:$0xf0] }
  0x1f   :  { %280 = vmatpush.bf16.msra.mxu0 %v1024_v10  ;;  %v988_v28 = vor.u32 %v1217_v25, %v987_v23  ;;  %v992_v29 = vor.u32 %v1216_v26, %v989_v27  ;;  %v975_v30 = vld [vmem:[#allocation5 + $0x30] sm:$0xf]  ;;  %v1214_v31 = vld [vmem:[#allocation5 + $0x38] sm:$0xf0]  ;;  %v1213_v32 = vld [vmem:[#allocation5 + $0x34] sm:$0xf] }
  0x20   :  { %294 = vmatpush.bf16.msra.mxu1 %v1028_v11  ;;  %v977_v33 = vld [vmem:[#allocation5 + $0x3c] sm:$0xf0]  ;;  %v976_v34 = vor.u32 %v1214_v31, %v975_v30  ;;  %v963_v36 = vld [vmem:[#allocation5 + $0x18] sm:$0xf]  ;;  %v1211_v37 = vld [vmem:[#allocation5 + $0x20] sm:$0xf0] }
  0x21   :  { %v980_v35 = vor.u32 %v1213_v32, %v977_v33  ;;  %v1210_v38 = vld [vmem:[#allocation5 + $0x1c] sm:$0xf]  ;;  %v965_v39 = vld [vmem:[#allocation5 + $0x24] sm:$0xf0]  ;;  %v964_v40 = vor.u32 %v1211_v37, %v963_v36  ;;  %v951_v42 = vld [vmem:[#allocation5] sm:$0xf] }
  0x22   :  { %v968_v41 = vor.u32 %v1210_v38, %v965_v39  ;;  %v1208_v43 = vld [vmem:[#allocation5 + $0x8] sm:$0xf0]  ;;  %v1207_v44 = vld [vmem:[#allocation5 + $0x4] sm:$0xf]  ;;  %v953_v45 = vld [vmem:[#allocation5 + $0xc] sm:$0xf0] }
  0x23   :  { %281 = vmatpush.bf16.msra.mxu0 %v1012_v16  ;;  %v952_v46 = vor.u32 %v1208_v43, %v951_v42  ;;  %v1550_v47 = vld [vmem:[#allocation2] sm:$0xff]  ;;  %v1552_v48 = vld [vmem:[#allocation2 + $0x8] sm:$0xff]  ;;  %v956_v49 = vor.u32 %v1207_v44, %v953_v45  ;;  %v1227_v63 = vld [vmem:[#allocation5 + $0xa0] sm:$0xf0]  ;;  %vm351_vm0 = vcmask 64512   ;;  %vm381_vm1 = vcmask 1043456  }
  0x24   :  { %295 = vmatpush.bf16.msra.mxu1 %v1016_v17  ;;  %v114_v50 = vpack.c.bf16 %v1552_v48, %v1550_v47  ;;  %v1043_v59 = vld [vmem:[#allocation5 + $0xb0] sm:$0xf]  ;;  %v1230_v60 = vld [vmem:[#allocation5 + $0xb8] sm:$0xf0]  ;;  %v1031_v61 = vld [vmem:[#allocation5 + $0x98] sm:$0xf] }
  0x25   :  { %v1044_v62 = vor.u32 %v1230_v60, %v1043_v59  ;;  %v1032_v0 = vor.u32 %v1227_v63, %v1031_v61  ;;  %v1019_v1 = vld [vmem:[#allocation5 + $0x80] sm:$0xf]  ;;  %v1224_v2 = vld [vmem:[#allocation5 + $0x88] sm:$0xf0]  ;;  %v1007_v5 = vld [vmem:[#allocation5 + $0x68] sm:$0xf] }
  0x26   :  { %v1020_v3 = vor.u32 %v1224_v2, %v1019_v1  ;;  %v1221_v6 = vld [vmem:[#allocation5 + $0x70] sm:$0xf0]  ;;  %v995_v9 = vld [vmem:[#allocation5 + $0x50] sm:$0xf]  ;;  %v1218_v10 = vld [vmem:[#allocation5 + $0x58] sm:$0xf0] }
  0x27   :  { %282 = vmatpush.bf16.msra.mxu0 %v1000_v22  ;;  %307 = vmatpush.bf16.msra.mxu2 %v1044_v62  ;;  %v1008_v8 = vor.u32 %v1221_v6, %v1007_v5  ;;  %v996_v11 = vor.u32 %v1218_v10, %v995_v9  ;;  %v983_v13 = vld [vmem:[#allocation5 + $0x38] sm:$0xf]  ;;  %v1215_v14 = vld [vmem:[#allocation5 + $0x40] sm:$0xf0]  ;;  %v971_v16 = vld [vmem:[#allocation5 + $0x20] sm:$0xf] }
  0x28   :  { %296 = vmatpush.bf16.msra.mxu1 %v1004_v24  ;;  %v984_v15 = vor.u32 %v1215_v14, %v983_v13  ;;  %v1212_v17 = vld [vmem:[#allocation5 + $0x28] sm:$0xf0]  ;;  %v959_v20 = vld [vmem:[#allocation5 + $0x8] sm:$0xf]  ;;  %v1209_v21 = vld [vmem:[#allocation5 + $0x10] sm:$0xf0] }
  0x29   :  { %v972_v18 = vor.u32 %v1212_v17, %v971_v16  ;;  %v960_v23 = vor.u32 %v1209_v21, %v959_v20  ;;  %v1237_v42 = vld [vmem:[#allocation7 + $0x30] sm:$0xff]  ;;  %v1236_v44 = vld [vmem:[#allocation7 + $0x28] sm:$0xff]  ;;  %v1235_v45 = vld [vmem:[#allocation7 + $0x20] sm:$0xff]  ;;  %s1478_s20 = smov [#allocation11]   ;;  %s934_s23 = sshll.u32 %s1619_s9, 4  ;;  %s935_s23 = int_to_ptr.hbm [resolvable:$true] %s934_s23 }
  0x2a   :  { %v1137_v17 = vld [vmem:[#allocation8 + $0x70] sm:$0xf]  ;;  %v1139_v21 = vld [vmem:[#allocation8 + $0x78] sm:$0xf0] }
  0x2b   :  { %283 = vmatpush.bf16.msra.mxu0 %v988_v28  ;;  %308 = vmatpush.bf16.msra.mxu2 %v1032_v0 }
  0x2c   :  { %297 = vmatpush.bf16.msra.mxu1 %v992_v29 }
  0x2f   :  { %284 = vmatpush.bf16.msra.mxu0 %v976_v34  ;;  %309 = vmatpush.bf16.msra.mxu2 %v1020_v3 }
  0x30   :  { %298 = vmatpush.bf16.msra.mxu1 %v980_v35 }
  0x33   :  { %285 = vmatpush.bf16.msra.mxu0 %v964_v40  ;;  %310 = vmatpush.bf16.msra.mxu2 %v1008_v8 }
  0x34   :  { %299 = vmatpush.bf16.msra.mxu1 %v968_v41  ;;  %v1238_v41 = vld [vmem:[#allocation7 + $0x38] sm:$0xff] }
  0x37   :  { %286 = vmatpush.bf16.msra.mxu0 %v952_v46  ;;  %311 = vmatpush.bf16.msra.mxu2 %v996_v11 }
  0x38   :  { %300 = vmatpush.bf16.msra.mxu1 %v956_v49 }
  0x3a   :  { %287 = vmatmul.bf16.vlgmr.msra.gmra.mxu0 %v114_v50 }
  0x3b   :  { %301 = vmatmul.bf16.vlgmr.msra.gmra.mxu1 %v114_v50  ;;  %312 = vmatpush.bf16.msra.mxu2 %v984_v15 }
  0x3c   :  { %482 = vmatpush.bf16.msrb.mxu1 %v1238_v41  ;;  %v1105_v41 = vld [vmem:[#allocation8 + $0x30] sm:$0xf] }
  0x3f   :  { %313 = vmatpush.bf16.msra.mxu2 %v972_v18  ;;  %v1254_v18 = vld [vmem:[#allocation8 + $0x74] sm:$0xf0] }
  0x40   :  { %483 = vmatpush.bf16.msrb.mxu1 %v1237_v42  ;;  %v1138_v20 = vor.u32 %v1254_v18, %v1137_v17  ;;  %v1246_v42 = vld [vmem:[#allocation8 + $0x34] sm:$0xf0] }
  0x43   :  { %314 = vmatpush.bf16.msra.mxu2 %v960_v23  ;;  %v1129_v23 = vld [vmem:[#allocation8 + $0x60] sm:$0xf] }
  0x44   :  { %484 = vmatpush.bf16.msrb.mxu1 %v1236_v44  ;;  %v1106_v44 = vor.u32 %v1246_v42, %v1105_v41  ;;  %v1257_v41 = vld [vmem:[#allocation10 + $0x10] sm:$0xff] }
  0x45   :  { %v1265_v42 = vld [vmem:[#allocation10 + $0x50] sm:$0xff] }
  0x46   :  { %315 = vmatmul.bf16.vlgmr.msra.gmra.mxu2 %v114_v50 }
  0x47   :  { %652 = vmatpush.bf16.msrb.mxu2 %v1138_v20 }
  0x48   :  { %485 = vmatpush.bf16.msrb.mxu1 %v1235_v45  ;;  %v1107_v45 = vld [vmem:[#allocation8 + $0x38] sm:$0xf0] }
  0xb7   :  { %v288_v53 = vpop.f32.mrf.mxu0 }
  0xb8   :  { %v302_v51 = vpop.f32.mrf.mxu1  ;;  %v321_v54 = vpack.c.bf16 %v288_v53, %v288_v53 }
  0xb9   :  { %v323_v52 = vpack.c.bf16 %v302_v51, %v302_v51  ;;  %v1234_v51 = vld [vmem:[#allocation7 + $0x18] sm:$0xff] }
  0xba   :  { %486 = vmatpush.bf16.msrb.mxu1 %v1234_v51  ;;  %v1243_v51 = vld [vmem:[#allocation8 + $0x24] sm:$0xf] }
  0xbb   :  { %332 = vmatpush.bf16.xpose.msra.mxu3 %v323_v52 }
  0xbf   :  { %v290_v57 = vpop.f32.mrf.mxu0 }
  0xc0   :  { %v304_v55 = vpop.f32.mrf.mxu1  ;;  %v322_v58 = vpack.c.bf16 %v290_v57, %v290_v57  ;;  %v1232_v57 = vld [vmem:[#allocation7 + $0x8] sm:$0xff] }
  0xc1   :  { %v324_v56 = vpack.c.bf16 %v304_v55, %v304_v55 }
  0xc2   :  { %333 = vmatmul.bf16.vlgmr.msra.gmra.mxu3 %v321_v54 }
  0xc3   :  { %345 = vmatpush.bf16.xpose.msrb.mxu3 %v324_v56  ;;  %v1233_v56 = vld [vmem:[#allocation7 + $0x10] sm:$0xff] }
  0xc4   :  { %487 = vmatpush.bf16.msrb.mxu1 %v1233_v56  ;;  %v1242_v56 = vld [vmem:[#allocation8 + $0x14] sm:$0xf0] }
  0xc8   :  { %488 = vmatpush.bf16.msrb.mxu1 %v1232_v57  ;;  %v1241_v57 = vld [vmem:[#allocation8 + $0x14] sm:$0xf] }
  0xc9   :  { %v316_v35 = vpop.f32.mrf.mxu2 }
  0xca   :  { %v376_v36 = vpack.c.bf16 %v316_v35, %v316_v35  ;;  %v1113_v35 = vld [vmem:[#allocation8 + $0x40] sm:$0xf] }
  0xcc   :  { %v383_v37 = vsel %vm381_vm1, %v376_v36, 0  ;;  %v1248_v36 = vld [vmem:[#allocation8 + $0x44] sm:$0xf0] }
  0xcd   :  { %392 = vmatpush.bf16.msra.mxu3 %v383_v37  ;;  %v1247_v37 = vld [vmem:[#allocation8 + $0x44] sm:$0xf] }
  0xd1   :  { %v318_v38 = vpop.f32.mrf.mxu2 }
  0xd2   :  { %346 = vmatmul.bf16.vlgmr.msrb.gmra.mxu3 %v322_v58  ;;  %v377_v39 = vpack.c.bf16 %v318_v38, %v318_v38  ;;  %v1231_v58 = vld [vmem:[#allocation7] sm:$0xff]  ;;  %v1114_v38 = vor.u32 %v1248_v36, %v1113_v35  ;;  %v1260_v35 = vld [vmem:[#allocation10 + $0x28] sm:$0xff] }
  0xd3   :  { %489 = vmatpush.bf16.msrb.mxu1 %v1231_v58  ;;  %v1268_v36 = vld [vmem:[#allocation10 + $0x68] sm:$0xff] }
  0xd4   :  { %v402_v40 = vsel %vm381_vm1, %v377_v39, 0  ;;  %v1115_v39 = vld [vmem:[#allocation8 + $0x48] sm:$0xf0] }
  0xd5   :  { %411 = vmatpush.bf16.msrb.mxu0 %v402_v40  ;;  %v1118_v40 = vor.u32 %v1247_v37, %v1115_v39  ;;  %v1259_v37 = vld [vmem:[#allocation10 + $0x20] sm:$0xff]  ;;  %v1258_v39 = vld [vmem:[#allocation10 + $0x18] sm:$0xff] }
 0x145   :  { %v334_v4 = vpop.f32.mrf.mxu3 }
 0x146   :  { %v352_v7 = vsel %vm351_vm0, %v334_v4, -inf }
 0x147   :  { %353 = vmax.xlane.f32.xlu0 %v352_v7 }
 0x14d   :  { %v336_v12 = vpop.f32.mrf.mxu3 }
 0x155   :  { %v347_v19 = vpop.f32.mrf.mxu3 }
 0x156   :  { %v355_v22 = vsel %vm351_vm0, %v347_v19, -inf }
 0x157   :  { %356 = vmax.xlane.f32.xlu0 %v355_v22 }
 0x15d   :  { %v349_v24 = vpop.f32.mrf.mxu3 }
 0x15e   :  { %v1252_v24 = vld [vmem:[#allocation8 + $0x64] sm:$0xf0] }
 0x1ba   :  { %v354_v25 = vpop.xlane.xlu0 %353 }
 0x1bb   :  { %v358_v26 = vsub.f32 %v334_v4, %v354_v25  ;;  %v1477_v4 = vmov 128.0   ;;  %v1251_v25 = vld [vmem:[#allocation8 + $0x64] sm:$0xf] }
 0x1bd   :  { %v360_v27 = vmul.f32 1.442695, %v358_v26  ;;  %v1130_v26 = vor.u32 %v1252_v24, %v1129_v23  ;;  %v1284_v23 = vld [vmem:[%s1615_s5] ss:$0 sm:$0xff] }
 0x1bf   :  { %1288 = vpow2.f32 %v360_v27  ;;  %v1131_v27 = vld [vmem:[#allocation8 + $0x68] sm:$0xf0]  ;;  %653 = vmatpush.bf16.msrb.mxu2 %v1130_v26 }
 0x1c5   :  { %v1289_v28 = vpop.eup %1288 }
 0x1c6   :  { %v364_v29 = vsel %vm351_vm0, %v1289_v28, 0.0 }
 0x1c7   :  { %365 = vadd.xlane.f32.xlu1 %v364_v29  ;;  %v1121_v29 = vld [vmem:[#allocation8 + $0x50] sm:$0xf] }
 0x1ca   :  { %v357_v30 = vpop.xlane.xlu0 %356 }
 0x1cb   :  { %v359_v31 = vsub.f32 %v347_v19, %v357_v30  ;;  %v1253_v19 = vld [vmem:[#allocation8 + $0x74] sm:$0xf]  ;;  %v1250_v30 = vld [vmem:[#allocation8 + $0x54] sm:$0xf0] }
 0x1cc   :  { %v1142_v22 = vor.u32 %v1253_v19, %v1139_v21 }
 0x1cd   :  { %v362_v32 = vmul.f32 1.442695, %v359_v31  ;;  %v1249_v31 = vld [vmem:[#allocation8 + $0x54] sm:$0xf] }
 0x1ce   :  { %666 = vmatpush.bf16.msrb.mxu3 %v1142_v22 }
 0x1cf   :  { %1290 = vpow2.f32 %v362_v32  ;;  %v1122_v32 = vor.u32 %v1250_v30, %v1121_v29 }
 0x1d1   :  { %654 = vmatpush.bf16.msrb.mxu2 %v1122_v32  ;;  %v1262_v32 = vld [vmem:[#allocation10 + $0x38] sm:$0xff] }
 0x1d2   :  { %846 = vmatpush.bf16.msra.mxu0 %v1262_v32 }
 0x1d5   :  { %v1291_v33 = vpop.eup %1290  ;;  %655 = vmatpush.bf16.msrb.mxu2 %v1114_v38  ;;  %v1267_v38 = vld [vmem:[#allocation10 + $0x60] sm:$0xff] }
 0x1d6   :  { %v367_v34 = vsel %vm351_vm0, %v1291_v33, 0.0 }
 0x1d7   :  { %368 = vadd.xlane.f32.xlu1 %v367_v34 }
 0x1d9   :  { %656 = vmatpush.bf16.msrb.mxu2 %v1106_v44  ;;  %v1264_v44 = vld [vmem:[#allocation10 + $0x48] sm:$0xff] }
 0x23a   :  { %v366_v43 = vpop.xlane.xlu1 %365 }
 0x23b   :  { %1292 = vrcp.f32 %v366_v43  ;;  %v1245_v43 = vld [vmem:[#allocation8 + $0x34] sm:$0xf] }
 0x241   :  { %v1293_v46 = vpop.eup %1292 }
 0x242   :  { %v372_v49 = vmul.f32 %v1293_v46, %v1289_v28  ;;  %v1134_v28 = vor.u32 %v1251_v25, %v1131_v27  ;;  %v1110_v46 = vor.u32 %v1245_v43, %v1107_v45  ;;  %v1256_v43 = vld [vmem:[#allocation10 + $0x8] sm:$0xff]  ;;  %v1255_v45 = vld [vmem:[#allocation10] sm:$0xff] }
 0x244   :  { %v374_v50 = vpack.c.bf16 %v372_v49, %v372_v49  ;;  %667 = vmatpush.bf16.msrb.mxu3 %v1134_v28  ;;  %v1097_v49 = vld [vmem:[#allocation8 + $0x20] sm:$0xf]  ;;  %v1285_v28 = vld [vmem:[%s1616_s6] ss:$0 sm:$0xff] }
 0x246   :  { %1045 = vmatmul.msk.bf16.vlgmr.msra.gmra.mxu3 %vm351_vm0, %v374_v50  ;;  %v1244_v50 = vld [vmem:[#allocation8 + $0x24] sm:$0xf0] }
 0x24a   :  { %v369_v52 = vpop.xlane.xlu1 %368 }
 0x24b   :  { %1294 = vrcp.f32 %v369_v52  ;;  %v1098_v52 = vor.u32 %v1244_v50, %v1097_v49 }
 0x24c   :  { %1296 = vrcp.f32 %v1477_v4 }
 0x24d   :  { %657 = vmatpush.bf16.msrb.mxu2 %v1098_v52 }
 0x251   :  { %v1295_v53 = vpop.eup %1294 }
 0x252   :  { %v373_v54 = vmul.f32 %v1295_v53, %v1291_v33  ;;  %v1297_v5 = vpop.eup %1296  ;;  %v1123_v33 = vld [vmem:[#allocation8 + $0x58] sm:$0xf0]  ;;  %v1099_v53 = vld [vmem:[#allocation8 + $0x28] sm:$0xf0] }
 0x253   :  { %v503_v6 = vmul.f32 128.0, %v1297_v5  ;;  %vm507_vm2 = vweird.f32 %v1297_v5  ;;  %v1126_v34 = vor.u32 %v1249_v31, %v1123_v33  ;;  %v1270_v33 = vld [vmem:[#allocation10 + $0x78] sm:$0xff] }
 0x254   :  { %v375_v55 = vpack.c.bf16 %v373_v54, %v373_v54  ;;  %v1102_v54 = vor.u32 %v1243_v51, %v1099_v53  ;;  %860 = vmatpush.bf16.msra.mxu1 %v1270_v33 }
 0x255   :  { %v504_v7 = vsub.f32 1.0, %v503_v6  ;;  %668 = vmatpush.bf16.msrb.mxu3 %v1126_v34  ;;  %v1269_v34 = vld [vmem:[#allocation10 + $0x70] sm:$0xff] }
 0x256   :  { %1046 = vmatmul.msk.bf16.vlgmr.msrb.gmra.mxu0 %vm351_vm0, %v375_v55  ;;  %v1089_v55 = vld [vmem:[#allocation8 + $0x10] sm:$0xf] }
 0x257   :  { %v505_v8 = vmul.f32 %v1297_v5, %v504_v7  ;;  %v1090_v58 = vor.u32 %v1242_v56, %v1089_v55 }
 0x258   :  { %861 = vmatpush.bf16.msra.mxu1 %v1269_v34 }
 0x259   :  { %v506_v9 = vadd.f32 %v1297_v5, %v505_v8  ;;  %669 = vmatpush.bf16.msrb.mxu3 %v1118_v40  ;;  %658 = vmatpush.bf16.msrb.mxu2 %v1090_v58  ;;  %v1266_v40 = vld [vmem:[#allocation10 + $0x58] sm:$0xff] }
 0x25b   :  { %v1564_v10 = vsel %vm507_vm2, %v1297_v5, %v506_v9 }
 0x25c   :  { %862 = vmatpush.bf16.msra.mxu1 %v1268_v36 }
 0x25d   :  { %670 = vmatpush.bf16.msrb.mxu3 %v1110_v46  ;;  %v1263_v46 = vld [vmem:[#allocation10 + $0x40] sm:$0xff] }
 0x260   :  { %863 = vmatpush.bf16.msra.mxu1 %v1267_v38 }
 0x261   :  { %671 = vmatpush.bf16.msrb.mxu3 %v1102_v54 }
 0x264   :  { %864 = vmatpush.bf16.msra.mxu1 %v1266_v40 }
 0x268   :  { %865 = vmatpush.bf16.msra.mxu1 %v1265_v42 }
 0x26c   :  { %866 = vmatpush.bf16.msra.mxu1 %v1264_v44 }
 0x270   :  { %867 = vmatpush.bf16.msra.mxu1 %v1263_v46 }
 0x2c9   :  { %v394_v59 = vpop.f32.mrf.mxu3 }
 0x2d1   :  { %v396_v60 = vpop.f32.mrf.mxu3 }
 0x2d3   :  { %v413_v61 = vpop.f32.mrf.mxu0 }
 0x2d4   :  { %v417_v62 = vpack.c.bf16 %v413_v61, %v394_v59  ;;  %v1091_v59 = vld [vmem:[#allocation8 + $0x18] sm:$0xf0]  ;;  %v1081_v61 = vld [vmem:[#allocation8] sm:$0xf] }
 0x2d5   :  { %v1094_v60 = vor.u32 %v1241_v57, %v1091_v59 }
 0x2d6   :  { %490 = vmatmul.bf16.vlgmr.msrb.gmra.mxu1 %v417_v62  ;;  %v1240_v62 = vld [vmem:[#allocation8 + $0x4] sm:$0xf0] }
 0x2d7   :  { %672 = vmatpush.bf16.msrb.mxu3 %v1094_v60 }
 0x2db   :  { %v415_v63 = vpop.f32.mrf.mxu0 }
 0x2dc   :  { %v1239_v63 = vld [vmem:[#allocation8 + $0x4] sm:$0xf] }
 0x353   :  { %v491_v0 = vpop.f32.mrf.mxu1 }
 0x354   :  { %v496_v1 = vadd.f32 %v491_v0, %v1550_v47 }
 0x356   :  { %498 = vadd.xlane.f32.xlu2 %v496_v1 }
 0x35b   :  { %v493_v2 = vpop.f32.mrf.mxu1 }
 0x35c   :  { %v497_v3 = vadd.f32 %v493_v2, %v1552_v48  ;;  %v1083_v2 = vld [vmem:[#allocation8 + $0x8] sm:$0xf0] }
 0x35d   :  { %v1086_v4 = vor.u32 %v1239_v63, %v1083_v2 }
 0x35e   :  { %500 = vadd.xlane.f32.xlu2 %v497_v3 }
 0x35f   :  { %673 = vmatpush.bf16.msrb.mxu3 %v1086_v4 }
 0x3c9   :  { %v499_v11 = vpop.xlane.xlu2 %498 }
 0x3ca   :  { %v509_v12 = vmul.f32 %v1564_v10, %v499_v11 }
 0x3cc   :  { %v1567_v13 = vsub.f32 %v496_v1, %v509_v12  ;;  %v1082_v1 = vor.u32 %v1240_v62, %v1081_v61 }
 0x3ce   :  { %v513_v47 = vmul.f32 %v1567_v13, %v1567_v13  ;;  %659 = vmatpush.bf16.msrb.mxu2 %v1082_v1 }
 0x3d0   :  { %515 = vadd.xlane.f32.xlu0 %v513_v47 }
 0x3d1   :  { %v501_v48 = vpop.xlane.xlu2 %500 }
 0x3d2   :  { %v510_v14 = vmul.f32 %v1564_v10, %v501_v48 }
 0x3d4   :  { %v1572_v15 = vsub.f32 %v497_v3, %v510_v14 }
 0x3d6   :  { %v514_v16 = vmul.f32 %v1572_v15, %v1572_v15 }
 0x3d8   :  { %517 = vadd.xlane.f32.xlu1 %v514_v16 }
 0x443   :  { %v516_v0 = vpop.xlane.xlu0 %515 }
 0x444   :  { %v519_v3 = vmul.f32 %v516_v0, %v1564_v10 }
 0x446   :  { %v521_v5 = vadd.f32 1e-06, %v519_v3 }
 0x448   :  { %1298 = vrsqrt.f32 %v521_v5  ;;  %vm529_vm4 = vweird.f32 %v521_v5 }
 0x44b   :  { %v518_v6 = vpop.xlane.xlu1 %517 }
 0x44c   :  { %v520_v7 = vmul.f32 %v518_v6, %v1564_v10 }
 0x44e   :  { %v1299_v8 = vpop.eup %1298  ;;  %v522_v9 = vadd.f32 1e-06, %v520_v7 }
 0x44f   :  { %v524_v11 = vmul.f32 %v1299_v8, %v521_v5  ;;  %vm530_vm3 = vweird.f32 %v1299_v8 }
 0x450   :  { %1300 = vrsqrt.f32 %v522_v9  ;;  %vm531_vm5 = vmor %vm529_vm4, %vm530_vm3  ;;  %vm539_vm7 = vweird.f32 %v522_v9 }
 0x451   :  { %v525_v12 = vmul.f32 %v1299_v8, %v524_v11 }
 0x453   :  { %v526_v47 = vmul.f32 0.5, %v525_v12 }
 0x455   :  { %v527_v48 = vsub.f32 1.5, %v526_v47 }
 0x456   :  { %v1301_v14 = vpop.eup %1300 }
 0x457   :  { %v528_v16 = vmul.f32 %v1299_v8, %v527_v48  ;;  %v534_v17 = vmul.f32 %v1301_v14, %v522_v9  ;;  %vm540_vm6 = vweird.f32 %v1301_v14 }
 0x458   :  { %vm541_vm8 = vmor %vm539_vm7, %vm540_vm6 }
 0x459   :  { %v535_v18 = vmul.f32 %v1301_v14, %v534_v17  ;;  %v532_v19 = vsel %vm531_vm5, %v1299_v8, %v528_v16 }
 0x45a   :  { %v543_v22 = vmul.f32 %v532_v19, %v1567_v13 }
 0x45b   :  { %v536_v20 = vmul.f32 0.5, %v535_v18 }
 0x45c   :  { %v548_v27 = vmul.f32 %v1284_v23, %v543_v22 }
 0x45d   :  { %v537_v21 = vsub.f32 1.5, %v536_v20 }
 0x45e   :  { %v1586_v30 = vadd.f32 %v1285_v28, %v548_v27 }
 0x45f   :  { %v538_v24 = vmul.f32 %v1301_v14, %v537_v21 }
 0x461   :  { %v542_v25 = vsel %vm541_vm8, %v1301_v14, %v538_v24 }
 0x462   :  { %v544_v26 = vmul.f32 %v542_v25, %v1572_v15  ;;  %v1261_v15 = vld [vmem:[#allocation10 + $0x30] sm:$0xff] }
 0x463   :  { %847 = vmatpush.bf16.msra.mxu0 %v1261_v15 }
 0x464   :  { %v549_v29 = vmul.f32 %v1284_v23, %v544_v26 }
 0x466   :  { %v1588_v31 = vadd.f32 %v1285_v28, %v549_v29 }
 0x467   :  { %848 = vmatpush.bf16.msra.mxu0 %v1260_v35 }
 0x468   :  { %v555_v13 = vpack.c.bf16 %v1588_v31, %v1586_v30 }
 0x46a   :  { %660 = vmatmul.bf16.vlgmr.msrb.gmra.mxu2 %v555_v13  ;;  %674 = vmatmul.bf16.vlgmr.msrb.gmra.mxu3 %v555_v13 }
 0x46b   :  { %849 = vmatpush.bf16.msra.mxu0 %v1259_v37 }
 0x46f   :  { %850 = vmatpush.bf16.msra.mxu0 %v1258_v39 }
 0x473   :  { %851 = vmatpush.bf16.msra.mxu0 %v1257_v41 }
 0x477   :  { %852 = vmatpush.bf16.msra.mxu0 %v1256_v43 }
 0x47b   :  { %853 = vmatpush.bf16.msra.mxu0 %v1255_v45 }
 0x4ed   :  { %v661_v49 = vpop.f32.mrf.mxu2  ;;  %v675_v50 = vpop.f32.mrf.mxu3 }
 0x4ee   :  { %v680_v51 = vmul.f32 %v661_v49, %v661_v49  ;;  %v681_v52 = vmul.f32 %v675_v50, %v675_v50 }
 0x4f0   :  { %v684_v53 = vmul.f32 %v680_v51, %v661_v49  ;;  %v685_v54 = vmul.f32 %v681_v52, %v675_v50 }
 0x4f2   :  { %v688_v55 = vmul.f32 0.044715, %v684_v53  ;;  %v689_v56 = vmul.f32 0.044715, %v685_v54 }
 0x4f4   :  { %v692_v57 = vadd.f32 %v688_v55, %v661_v49  ;;  %v693_v58 = vadd.f32 %v689_v56, %v675_v50 }
 0x4f5   :  { %v663_v59 = vpop.f32.mrf.mxu2  ;;  %v677_v60 = vpop.f32.mrf.mxu3 }
 0x4f6   :  { %v696_v61 = vmul.f32 0.7978846, %v692_v57  ;;  %v682_v62 = vmul.f32 %v663_v59, %v663_v59  ;;  %v683_v63 = vmul.f32 %v677_v60, %v677_v60  ;;  %v697_v0 = vmul.f32 0.7978846, %v693_v58  ;;  %v1286_v58 = vld [vmem:[%s1617_s7] ss:$0 sm:$0xff] }
 0x4f7   :  { %s932_s7 = sshll.u32 %s1478_s20, 4  ;;  %s933_s7 = int_to_ptr.vmem [resolvable:$true] %s932_s7 }
 0x4f8   :  { %v686_v1 = vmul.f32 %v682_v62, %v663_v59  ;;  %v687_v2 = vmul.f32 %v683_v63, %v677_v60  ;;  %1302 = vtanh.f32 %v696_v61  ;;  %v1287_v61 = vld [vmem:[%s1618_s8] ss:$0 sm:$0xff] }
 0x4f9   :  { %1304 = vtanh.f32 %v697_v0 }
 0x4fa   :  { %v690_v3 = vmul.f32 0.044715, %v686_v1  ;;  %v691_v4 = vmul.f32 0.044715, %v687_v2 }
 0x4fc   :  { %v694_v5 = vadd.f32 %v690_v3, %v663_v59  ;;  %v695_v6 = vadd.f32 %v691_v4, %v677_v60 }
 0x4fe   :  { %v698_v7 = vmul.f32 0.7978846, %v694_v5  ;;  %v699_v8 = vmul.f32 0.7978846, %v695_v6  ;;  %v1303_v9 = vpop.eup %1302 }
 0x4ff   :  { %v1305_v11 = vpop.eup %1304  ;;  %v704_v12 = vadd.f32 1.0, %v1303_v9 }
 0x500   :  { %1306 = vtanh.f32 %v698_v7  ;;  %v705_v47 = vadd.f32 1.0, %v1305_v11 }
 0x501   :  { %1308 = vtanh.f32 %v699_v8  ;;  %v708_v16 = vmul.f32 0.5, %v704_v12 }
 0x502   :  { %v709_v18 = vmul.f32 0.5, %v705_v47 }
 0x503   :  { %v712_v22 = vmul.f32 %v708_v16, %v661_v49 }
 0x504   :  { %v713_v24 = vmul.f32 %v709_v18, %v675_v50 }
 0x506   :  { %v1307_v48 = vpop.eup %1306 }
 0x507   :  { %v1309_v14 = vpop.eup %1308  ;;  %v706_v17 = vadd.f32 1.0, %v1307_v48 }
 0x508   :  { %v707_v19 = vadd.f32 1.0, %v1309_v14 }
 0x509   :  { %v710_v20 = vmul.f32 0.5, %v706_v17 }
 0x50a   :  { %v711_v21 = vmul.f32 0.5, %v707_v19 }
 0x50b   :  { %v714_v23 = vmul.f32 %v710_v20, %v663_v59 }
 0x50c   :  { %v715_v25 = vmul.f32 %v711_v21, %v677_v60 }
 0x50d   :  { %v716_v26 = vpack.c.bf16 %v714_v23, %v712_v22 }
 0x50e   :  { %v717_v27 = vpack.c.bf16 %v715_v25, %v713_v24 }
 0x50f   :  { %854 = vmatmul.bf16.vlgmr.msra.gmra.mxu0 %v716_v26 }
 0x510   :  { %868 = vmatmul.bf16.vlgmr.msra.gmra.mxu1 %v717_v27 }
 0x58c   :  { %v855_v28 = vpop.f32.mrf.mxu0 }
 0x58d   :  { %v869_v29 = vpop.f32.mrf.mxu1 }
 0x58e   :  { %v870_v13 = vadd.f32 %v869_v29, %v855_v28 }
 0x590   :  { %v874_v32 = vadd.f32 %v870_v13, %v1586_v30 }
 0x592   :  { %876 = vadd.xlane.f32.xlu2 %v874_v32 }
 0x594   :  { %v857_v33 = vpop.f32.mrf.mxu0 }
 0x595   :  { %v871_v15 = vpop.f32.mrf.mxu1 }
 0x596   :  { %v872_v34 = vadd.f32 %v871_v15, %v857_v33 }
 0x598   :  { %v875_v35 = vadd.f32 %v872_v34, %v1588_v31 }
 0x59a   :  { %878 = vadd.xlane.f32.xlu0 %v875_v35 }
 0x605   :  { %v877_v36 = vpop.xlane.xlu2 %876 }
 0x606   :  { %v880_v37 = vmul.f32 %v877_v36, %v1564_v10 }
 0x608   :  { %v882_v38 = vsub.f32 %v874_v32, %v880_v37 }
 0x60a   :  { %v884_v39 = vmul.f32 %v882_v38, %v882_v38 }
 0x60c   :  { %886 = vadd.xlane.f32.xlu1 %v884_v39 }
 0x60d   :  { %v879_v40 = vpop.xlane.xlu0 %878 }
 0x60e   :  { %v881_v41 = vmul.f32 %v879_v40, %v1564_v10 }
 0x610   :  { %v883_v42 = vsub.f32 %v875_v35, %v881_v41 }
 0x612   :  { %v885_v43 = vmul.f32 %v883_v42, %v883_v42 }
 0x614   :  { %888 = vadd.xlane.f32.xlu2 %v885_v43 }
 0x67f   :  { %v887_v30 = vpop.xlane.xlu1 %886 }
 0x680   :  { %v890_v44 = vmul.f32 %v887_v30, %v1564_v10 }
 0x682   :  { %v892_v45 = vadd.f32 1e-06, %v890_v44 }
 0x684   :  { %1310 = vrsqrt.f32 %v892_v45  ;;  %vm900_vm10 = vweird.f32 %v892_v45 }
 0x687   :  { %v889_v46 = vpop.xlane.xlu2 %888 }
 0x688   :  { %v891_v31 = vmul.f32 %v889_v46, %v1564_v10 }
 0x68a   :  { %v1311_v49 = vpop.eup %1310  ;;  %v893_v50 = vadd.f32 1e-06, %v891_v31 }
 0x68b   :  { %v895_v51 = vmul.f32 %v1311_v49, %v892_v45  ;;  %vm901_vm9 = vweird.f32 %v1311_v49 }
 0x68c   :  { %1312 = vrsqrt.f32 %v893_v50  ;;  %vm902_vm11 = vmor %vm900_vm10, %vm901_vm9  ;;  %vm910_vm13 = vweird.f32 %v893_v50 }
 0x68d   :  { %v896_v52 = vmul.f32 %v1311_v49, %v895_v51 }
 0x68f   :  { %v897_v53 = vmul.f32 0.5, %v896_v52 }
 0x691   :  { %v898_v54 = vsub.f32 1.5, %v897_v53 }
 0x692   :  { %v1313_v55 = vpop.eup %1312 }
 0x693   :  { %v899_v56 = vmul.f32 %v1311_v49, %v898_v54  ;;  %v905_v57 = vmul.f32 %v1313_v55, %v893_v50  ;;  %vm911_vm12 = vweird.f32 %v1313_v55 }
 0x694   :  { %vm912_vm14 = vmor %vm910_vm13, %vm911_vm12 }
 0x695   :  { %v903_v59 = vsel %vm902_vm11, %v1311_v49, %v899_v56  ;;  %v906_v60 = vmul.f32 %v1313_v55, %v905_v57 }
 0x696   :  { %v914_v10 = vmul.f32 %v903_v59, %v882_v38 }
 0x697   :  { %v907_v62 = vmul.f32 0.5, %v906_v60 }
 0x698   :  { %v919_v63 = vmul.f32 %v1286_v58, %v914_v10 }
 0x699   :  { %v908_v0 = vsub.f32 1.5, %v907_v62 }
 0x69a   :  { %v924_v1 = vadd.f32 %v1287_v61, %v919_v63 }
 0x69b   :  { %v909_v2 = vmul.f32 %v1313_v55, %v908_v0 }
 0x69c   :  { %926 = vst [vmem:[#allocation11] sm:$0xff] %v924_v1 }
 0x69d   :  { %v913_v3 = vsel %vm912_vm14, %v1313_v55, %v909_v2 }
 0x69e   :  { %v915_v4 = vmul.f32 %v913_v3, %v883_v42 }
 0x6a0   :  { %v920_v5 = vmul.f32 %v1286_v58, %v915_v4 }
 0x6a2   :  { %v925_v6 = vadd.f32 %v1287_v61, %v920_v5 }
 0x6a4   :  { %927 = vst [vmem:[#allocation11 + $0x8] sm:$0xff] %v925_v6 }
 0x6a5   :  { %940 = dma.vmem_to_hbm [thread:$0]  %s933_s7, 256, %s935_s23, [#allocation4], %s1470_s1, %s1470_s1, %s1471_s24  }
 0x6a6   :  { %1464 = dma.done.wait [#allocation4], 256  }
 0x6a7   :  { %1465 = vsyncadd [#allocation4], 4294967040 }
 0x6a8   :  { %945 = vsyncpa [#allocation3], 1 }
 0x6a9   :  { %946 = vsyncpa [#allocation6], 1 }
 0x6aa   :  { %947 = vsyncpa [#allocation9], 1 }
 0x6ab   :  { %948 = vsyncpa [#allocation4], 1 }

</bundles_post_ra>
